<compile_context>
chip_gen: v6e
topology: v6e:2x2x1
jax: 0.10.0
libtpu: 0.0.40
codegen_flags: <defaults>
</compile_context>

<pallas_src>
import functools

import jax
import jax.numpy as jnp
from jax.experimental import pallas as pl
from jax.experimental.pallas import tpu as pltpu


def _round_up(x, m):
    return ((x + m - 1) // m) * m


def hybrid_embed_kernel(patches_ref, wb_ref, bb_ref, wp_ref, bp_ref, out_ref,
                        *, n_slabs, slab):
    def body(s, carry):
        r0 = pl.multiple_of(s * slab, slab)
        p = patches_ref[pl.ds(r0, slab), :]
        # backbone conv as matmul (im2col done in wrapper): bf16 x bf16 -> f32 acc
        feat = jnp.dot(p, wb_ref[...], preferred_element_type=jnp.float32)
        feat = jnp.maximum(feat + bb_ref[...], 0.0)            # bias + ReLU in f32
        # 1x1 conv projection == channel matmul; bf16 operands, f32 accumulation
        out = jnp.dot(feat.astype(jnp.bfloat16), wp_ref[...],
                      preferred_element_type=jnp.float32)
        out_ref[pl.ds(r0, slab), :] = (out + bp_ref[...]).astype(out_ref.dtype)
        return carry

    jax.lax.fori_loop(0, n_slabs, body, 0, unroll=True)


def hybrid_embed(x, wb, bb, wp, bp, *, patch=4, tm_max=1024, slab_target=256,
                 out_dtype=jnp.bfloat16, output="nchw"):
    """x: (B, C, H, W) NCHW float32.
    wb: backbone conv weight, torch layout (feature_dim, C, patch, patch)
    bb: (feature_dim,)
    wp: 1x1 proj weight, torch layout (embed_dim, feature_dim, 1, 1)
    bp: (embed_dim,)
    output: "nchw" (PyTorch HybridEmbed.forward layout, default),
            "tokens" -> (B, Hf*Wf, embed_dim) with no extra transpose pass,
            "nhwc"   -> (B, Hf, Wf, embed_dim), reshape-only.
    """
    B, C, H, W = x.shape
    feature_dim = wb.shape[0]
    embed_dim = wp.shape[0]
    Hf, Wf = H // patch, W // patch
    M = B * Hf * Wf
    K = C * patch * patch

    # lane-dense (multiple-of-128) contraction / output dims
    Kp = _round_up(K, 128)
    Nf = _round_up(feature_dim, 128)
    Ne = _round_up(embed_dim, 128)

    # Balanced M tiling: >=2 tiles whenever M allows (v7x has 2 TensorCores);
    # TM is a multiple of 8*n_slabs so in-kernel slabs stay sublane-aligned.
    num_tiles = max(pl.cdiv(M, tm_max), 1)
    if num_tiles == 1 and M >= 16:
        num_tiles = 2
    tm0 = pl.cdiv(M, num_tiles)
    n_slabs = max(pl.cdiv(tm0, slab_target), 1)
    TM = _round_up(tm0, 8 * n_slabs)
    SLAB = TM // n_slabs
    M_pad = num_tiles * TM

    # im2col for the non-overlapping stride-`patch` conv:
    # (B, C, H, W) -> (B, Hf, Wf, C, patch, patch) -> (M, K), padded to (M_pad, Kp)
    patches = x.reshape(B, C, Hf, patch, Wf, patch)
    patches = patches.transpose(0, 2, 4, 1, 3, 5).reshape(M, K)
    patches = jnp.pad(patches, ((0, M_pad - M), (0, Kp - K))).astype(jnp.bfloat16)

    # weights to matmul layout (K, N), zero-padded to lane-dense shapes
    wb_mat = wb.reshape(feature_dim, K).T                        # (K, feature_dim)
    wb_mat = jnp.pad(wb_mat, ((0, Kp - K), (0, Nf - feature_dim))).astype(jnp.bfloat16)
    bb_row = jnp.pad(bb, (0, Nf - feature_dim)).reshape(1, Nf).astype(jnp.float32)
    wp_mat = wp.reshape(embed_dim, feature_dim).T                # (feature_dim, embed_dim)
    wp_mat = jnp.pad(wp_mat, ((0, Nf - feature_dim), (0, Ne - embed_dim))
                     ).astype(jnp.bfloat16)
    bp_row = jnp.pad(bp, (0, Ne - embed_dim)).reshape(1, Ne).astype(jnp.float32)

    out_itemsize = jnp.dtype(out_dtype).itemsize
    # VMEM budget: double-buffered patches/out tiles + resident weights/biases
    # + per-slab feat intermediates; 2x headroom, floor 32 MiB, cap 64 MiB.
    vmem_need = (2 * TM * Kp * 2
                 + 2 * TM * Ne * out_itemsize
                 + 2 * (Kp * Nf + Nf * Ne) * 2 + (Nf + Ne) * 4
                 + SLAB * Nf * (4 + 2))
    vmem_limit = int(min(max(2 * vmem_need, 32 * 1024 * 1024), 64 * 1024 * 1024))

    kernel = functools.partial(hybrid_embed_kernel, n_slabs=n_slabs, slab=SLAB)

    bytes_accessed = (patches.size * 2 + wb_mat.size * 2 + wp_mat.size * 2
                      + bb_row.size * 4 + bp_row.size * 4
                      + M_pad * Ne * out_itemsize)

    out2d = pl.pallas_call(
        kernel,
        out_shape=jax.ShapeDtypeStruct((M_pad, Ne), out_dtype),
        grid=(num_tiles,),
        in_specs=[
            # tiled over M, double-buffered by the Pallas pipeline
            pl.BlockSpec((TM, Kp), lambda i: (i, 0)),
            # grid-invariant weights/biases: constant index_map -> DMA'd once,
            # VMEM-resident across the whole grid
            pl.BlockSpec((Kp, Nf), lambda i: (0, 0)),
            pl.BlockSpec((1, Nf), lambda i: (0, 0)),
            pl.BlockSpec((Nf, Ne), lambda i: (0, 0)),
            pl.BlockSpec((1, Ne), lambda i: (0, 0)),
        ],
        out_specs=pl.BlockSpec((TM, Ne), lambda i: (i, 0)),
        compiler_params=pltpu.CompilerParams(
            dimension_semantics=("parallel",),
            allow_input_fusion=[True, False, False, False, False],
            vmem_limit_bytes=vmem_limit,
        ),
        cost_estimate=pl.CostEstimate(
            flops=2 * M_pad * (Kp * Nf + Nf * Ne),
            transcendentals=0,
            bytes_accessed=int(bytes_accessed),
        ),
    )(patches, wb_mat, bb_row, wp_mat, bp_row)

    out2d = out2d[:M, :embed_dim]                    # strip padding -> (M, E)
    if output == "tokens":                           # (B, N, E): no extra movement
        return out2d.reshape(B, Hf * Wf, embed_dim)
    if output == "nhwc":                             # reshape-only
        return out2d.reshape(B, Hf, Wf, embed_dim)
    # "nchw": exact PyTorch HybridEmbed.forward layout (pays one transpose pass)
    return out2d.reshape(B, Hf, Wf, embed_dim).transpose(0, 3, 1, 2)


def _reference(x, wb, bb, wp, bp, *, patch=4):
    # pure-JAX reference using lax conv (NCHW), for a sanity check
    feat = jax.lax.conv_general_dilated(
        x, wb, window_strides=(patch, patch), padding="VALID",
        dimension_numbers=("NCHW", "OIHW", "NCHW"))
    feat = jnp.maximum(feat + bb[None, :, None, None], 0.0)
    out = jax.lax.conv_general_dilated(
        feat, wp, window_strides=(1, 1), padding="VALID",
        dimension_numbers=("NCHW", "OIHW", "NCHW"))
    return out + bp[None, :, None, None]


if __name__ == "__main__":
    B, C, H, W = 2, 4, 16, 16          # small NCHW input
    patch = 4                          # backbone downsample factor -> 4x4 feature map
    feature_dim = 8                    # backbone output channels
    embed_dim = 32                     # projection embedding dim

    key = jax.random.PRNGKey(0)
    kx, kwb, kbb, kwp, kbp = jax.random.split(key, 5)

    x = jax.random.normal(kx, (B, C, H, W), dtype=jnp.float32)
    wb = jax.random.normal(kwb, (feature_dim, C, patch, patch), dtype=jnp.float32) * 0.1
    bb = jax.random.normal(kbb, (feature_dim,), dtype=jnp.float32) * 0.1
    wp = jax.random.normal(kwp, (embed_dim, feature_dim, 1, 1), dtype=jnp.float32) * 0.1
    bp = jax.random.normal(kbp, (embed_dim,), dtype=jnp.float32) * 0.1

    # default: NCHW output (matches PyTorch module), bf16 storage
    out = hybrid_embed(x, wb, bb, wp, bp, patch=patch)
    out = jax.block_until_ready(out)

    ref = _reference(x, wb, bb, wp, bp, patch=patch)
    assert out.shape == (B, embed_dim, H // patch, W // patch), out.shape
    # bf16 operands + bf16 output with f32 accumulation -> loose tolerance
    err = float(jnp.abs(out.astype(jnp.float32) - ref).max())
    assert jnp.allclose(out.astype(jnp.float32), ref, atol=3e-2, rtol=3e-2), err

    # transpose-free token path (what a downstream ViT consumes)
    tok = hybrid_embed(x, wb, bb, wp, bp, patch=patch, output="tokens")
    tok = jax.block_until_ready(tok)
    assert tok.shape == (B, (H // patch) * (W // patch), embed_dim), tok.shape
    ref_tok = jnp.transpose(out, (0, 2, 3, 1)).reshape(B, -1, embed_dim)
    assert jnp.array_equal(tok, ref_tok)

    print("KERNEL_OK")
</pallas_src>

<mosaic_0001>
module attributes {stable_mosaic.version = 11 : i64} {
  func.func @hybrid_embed_kernel(%arg0: i32, %arg1: memref<16x128xbf16, #tpu.memory_space<vmem>>, %arg2: memref<128x128xbf16, #tpu.memory_space<vmem>>, %arg3: memref<1x128xf32, #tpu.memory_space<vmem>>, %arg4: memref<128x128xbf16, #tpu.memory_space<vmem>>, %arg5: memref<1x128xf32, #tpu.memory_space<vmem>>, %arg6: memref<16x128xbf16, #tpu.memory_space<vmem>>) attributes {dimension_semantics = [#tpu.dimension_semantics<parallel>], iteration_bounds = array<i64: 2>, scalar_prefetch = 0 : i64, scratch_operands = 0 : i64, tpu.core_type = #tpu.core_type<tc>, window_params = [{transform_indices = @transform_0, window_bounds = array<i64: 16, 128>}, {pipeline_mode = #tpu.pipeline_mode<synchronous>, transform_indices = @transform_1, window_bounds = array<i64: 128, 128>}, {pipeline_mode = #tpu.pipeline_mode<synchronous>, transform_indices = @transform_2, window_bounds = array<i64: 1, 128>}, {pipeline_mode = #tpu.pipeline_mode<synchronous>, transform_indices = @transform_3, window_bounds = array<i64: 128, 128>}, {pipeline_mode = #tpu.pipeline_mode<synchronous>, transform_indices = @transform_4, window_bounds = array<i64: 1, 128>}, {transform_indices = @transform_5, window_bounds = array<i64: 16, 128>}]} {
    %c0_i32 = arith.constant 0 : i32
    %c16_i32 = arith.constant 16 : i32
    %0 = arith.muli %c0_i32, %c16_i32 : i32
    %1 = tpu.assume_multiple %0, 16 : i32
    %2 = arith.index_cast %1 : i32 to index
    %c0 = arith.constant 0 : index
    %3 = vector.load %arg1[%2, %c0] : memref<16x128xbf16, #tpu.memory_space<vmem>>, vector<16x128xbf16>
    %c0_0 = arith.constant 0 : index
    %c0_1 = arith.constant 0 : index
    %4 = vector.load %arg2[%c0_0, %c0_1] : memref<128x128xbf16, #tpu.memory_space<vmem>>, vector<128x128xbf16>
    %cst = arith.constant dense<0.000000e+00> : vector<16x128xf32>
    %5 = tpu.matmul %3, %4, %cst {dimension_numbers = #tpu.dot_dimension_numbers<[1], [0], [0], [1], [0, 0, 1, 1], [], []>} : vector<16x128xbf16>, vector<128x128xbf16>, vector<16x128xf32> -> vector<16x128xf32>
    %c0_2 = arith.constant 0 : index
    %c0_3 = arith.constant 0 : index
    %6 = vector.load %arg3[%c0_2, %c0_3] : memref<1x128xf32, #tpu.memory_space<vmem>>, vector<1x128xf32>
    %7 = vector.broadcast %6 : vector<1x128xf32> to vector<16x128xf32>
    %8 = arith.addf %5, %7 : vector<16x128xf32>
    %cst_4 = arith.constant 0.000000e+00 : f32
    %9 = vector.broadcast %cst_4 : f32 to vector<16x128xf32>
    %10 = arith.maximumf %8, %9 : vector<16x128xf32>
    %11 = arith.truncf %10 : vector<16x128xf32> to vector<16x128xbf16>
    %c0_5 = arith.constant 0 : index
    %c0_6 = arith.constant 0 : index
    %12 = vector.load %arg4[%c0_5, %c0_6] : memref<128x128xbf16, #tpu.memory_space<vmem>>, vector<128x128xbf16>
    %cst_7 = arith.constant dense<0.000000e+00> : vector<16x128xf32>
    %13 = tpu.matmul %11, %12, %cst_7 {dimension_numbers = #tpu.dot_dimension_numbers<[1], [0], [0], [1], [0, 0, 1, 1], [], []>} : vector<16x128xbf16>, vector<128x128xbf16>, vector<16x128xf32> -> vector<16x128xf32>
    %c0_8 = arith.constant 0 : index
    %c0_9 = arith.constant 0 : index
    %14 = vector.load %arg5[%c0_8, %c0_9] : memref<1x128xf32, #tpu.memory_space<vmem>>, vector<1x128xf32>
    %15 = vector.broadcast %14 : vector<1x128xf32> to vector<16x128xf32>
    %16 = arith.addf %13, %15 : vector<16x128xf32>
    %17 = arith.truncf %16 : vector<16x128xf32> to vector<16x128xbf16>
    %18 = arith.index_cast %1 : i32 to index
    %c0_10 = arith.constant 0 : index
    %19 = vector.load %arg6[%18, %c0_10] : memref<16x128xbf16, #tpu.memory_space<vmem>>, vector<16x128xbf16>
    tpu.vector_store %arg6[%18, %c0_10], %17 {strides = array<i32>} : memref<16x128xbf16, #tpu.memory_space<vmem>>, vector<16x128xbf16>,
    %c1_i32 = arith.constant 1 : i32
    return
  }
  func.func @transform_0(%arg0: i32) -> (i32, i32) {
    %c0_i32 = arith.constant 0 : i32
    %c0_i32_0 = arith.constant 0 : i32
    return %arg0, %c0_i32 : i32, i32
  }
  func.func @transform_1(%arg0: i32) -> (i32, i32) {
    %c0_i32 = arith.constant 0 : i32
    %c0_i32_0 = arith.constant 0 : i32
    %c0_i32_1 = arith.constant 0 : i32
    return %c0_i32, %c0_i32_0 : i32, i32
  }
  func.func @transform_2(%arg0: i32) -> (i32, i32) {
    %c0_i32 = arith.constant 0 : i32
    %c0_i32_0 = arith.constant 0 : i32
    %c0_i32_1 = arith.constant 0 : i32
    return %c0_i32, %c0_i32_0 : i32, i32
  }
  func.func @transform_3(%arg0: i32) -> (i32, i32) {
    %c0_i32 = arith.constant 0 : i32
    %c0_i32_0 = arith.constant 0 : i32
    %c0_i32_1 = arith.constant 0 : i32
    return %c0_i32, %c0_i32_0 : i32, i32
  }
  func.func @transform_4(%arg0: i32) -> (i32, i32) {
    %c0_i32 = arith.constant 0 : i32
    %c0_i32_0 = arith.constant 0 : i32
    %c0_i32_1 = arith.constant 0 : i32
    return %c0_i32, %c0_i32_0 : i32, i32
  }
  func.func @transform_5(%arg0: i32) -> (i32, i32) {
    %c0_i32 = arith.constant 0 : i32
    %c0_i32_0 = arith.constant 0 : i32
    return %arg0, %c0_i32 : i32, i32
  }
}

</mosaic_0001>

<bundles_post_ra>
// kernel: tpu_custom_call.1
= control target key start
LH: loop header
LB: loop body
LE: loop exit
PB: predicated region body
PF: predicated region fallthrough
CT: control target
= control target key end

     0   :  { %10 = vsyncpa [#allocation3], 0  ;;  %s1222_s0 = inlined_call_operand.hbm [shape: bf16[32,128], index: 0, kind: input, shape index: {}]   ;;  %s1223_s1 = inlined_call_operand.hbm [shape: bf16[128,128], index: 1, kind: input, shape index: {}]   ;;  %s1224_s2 = inlined_call_operand.vmem [shape: f32[1,128], index: 2, kind: input, shape index: {}]   ;;  %s1225_s3 = inlined_call_operand.hbm [shape: bf16[128,128], index: 3, kind: input, shape index: {}]   ;;  %s1226_s4 = inlined_call_operand.vmem [shape: f32[1,128], index: 4, kind: input, shape index: {}]   ;;  %s1227_s5 = inlined_call_operand.hbm [shape: bf16[32,128], index: 5, kind: output, shape index: {}]  }
   0x1   :  { %12 = vsyncpa [#allocation3 + $0x1], 0 }
   0x2   :  { %13 = vsyncpa [#allocation6], 0 }
   0x3   :  { %14 = vsyncpa [#allocation4], 0 }
   0x4   :  { %16 = vsyncpa [#allocation4 + $0x1], 0  ;;  %s1012_s18 = smov 0   ;;  %s1014_s19 = smov 0  }
   0x5   :  { %s1016_s20 = smov 0   ;;  %s1018_s21 = smov 0  }
   0x6 LB: > { %s1033_s22 = sadd.s32 4294967295, %s970_s21   ;;  %s626_s23 = sadd.s32 4294967294, %s970_s21   ;;  %s970_s21 = sphi %s1018_s21, %s1250_s21   ;;  %s966_s20 = sphi %s1016_s20, %s1249_s20   ;;  %s962_s19 = sphi %s1014_s19, %s1248_s19   ;;  %s958_s18 = sphi %s1012_s18, %s1247_s18  }
   0x7   : > { %p42_p0 = scmp.ne.s32.totalorder %s962_s19, %s958_s18  ;;  %p1228_p1 = scmp.eq.s32.totalorder %s1033_s22, 0 }
   0x8   : > { %p150_p2 = scmp.eq.s32.totalorder %s1033_s22, 1  ;;  %p156_p3 = scmp.eq.s32.totalorder %s626_s23, 1 }
   0x9   : > { %p1042_p4 = por %p1228_p1, %p42_p0  ;;  %p627_p5 = scmp.ge.s32.totalorder %s970_s21, 1 }
   0xa   : > { %p1047_p6 = por %p156_p3, %p42_p0  ;;  %p163_p7 = scmp.lt.s32.totalorder %s970_s21, 3 }
   0xb   : > { %s1233_s24 = scalar_select %p1042_p4, 1, 0 }
   0xc   : > { %s1234_s25 = scalar_select %p1047_p6, 1, 0 }
   0xd   : > { %p1052_p8 = pnand %p627_p5, %p163_p7  ;;  %s972_s27 = smov [#allocation5]  }
   0xe   : > { %s175_s28 = sshll.u32 %s972_s27, 4  ;;  %s973_s30 = smov [#allocation7]   ;;  %s176_s28 = int_to_ptr.vmem [resolvable:$true] %s175_s28 }
   0xf   : > { %s1235_s26 = scalar_select %p1052_p8, 1, 0 }
  0x10   : > { %p744_p9 = pneg %p1052_p8  ;;  %s191_s6 = sshll.u32 %s973_s30, 4  ;;  %s192_s6 = int_to_ptr.vmem [resolvable:$true] %s191_s6 }
  0x11   : > { %s833_s7 = scalar_lea.vmem %s176_s28, 1024  ;;  %p841_p5 = scmp.lt.s32.totalorder %s176_s28, %s176_s28 }
  0x12   : > { %p1061_p11 = pnand %p744_p9, %p1228_p1  ;;  %p834_p13 = scmp.ne.s32.totalorder %s176_s28, %s833_s7 }
  0x13   : > { %p842_p7 = scmp.lt.s32.totalorder %s833_s7, %s833_s7 }
  0x14   : > { %p824_p12 = pneg %p1061_p11 }
  0x15   : > { %p843_p10 = por %p842_p7, %p841_p5 }
  0x16   : > { %p836_p0 = pnand %p834_p13, %p824_p12 }
  0x18   : > { %p837_p3 = pneg %p836_p0 }
  0x1a   : > { %p844_p9 = pnand %p843_p10, %p837_p3 }
  0x1c   : > { %847 = shalt.err (!%p844_p9)
}
  0x1d   : > { %s1229_s8 = smov 64   ;;  %s975_s9 = smov 4  }
  0x1e   : > { %747 = dma.hbm_to_vmem [thread:$0]  (!%p1061_p11), %s1223_s1, 1024, %s176_s28, [#allocation6], %s1229_s8, %s1229_s8, %s975_s9  }
  0x1f   : > { %s859_s12 = scalar_lea.vmem %s192_s6, 1024  ;;  %p867_p10 = scmp.lt.s32.totalorder %s192_s6, %s192_s6 }
  0x20   : > { %p860_p13 = scmp.ne.s32.totalorder %s192_s6, %s859_s12  ;;  %p868_p3 = scmp.lt.s32.totalorder %s859_s12, %s859_s12 }
  0x22   : > { %p862_p0 = pnand %p860_p13, %p824_p12  ;;  %p869_p7 = por %p868_p3, %p867_p10 }
  0x24   : > { %p863_p5 = pneg %p862_p0 }
  0x26   : > { %p870_p9 = pnand %p869_p7, %p863_p5 }
  0x28   : > { %873 = shalt.err (!%p870_p9)
}
  0x29   : > { %750 = dma.hbm_to_vmem [thread:$0]  (!%p1061_p11), %s1225_s3, 1024, %s192_s6, [#allocation6], %s1229_s8, %s1229_s8, %s975_s9  }
  0x2a   : > { %s1090_s15 = sadd.s32 1, %s970_s21   ;;  %s29_s16 = sadd.s32 1, %s966_s20 }
  0x2b   : > { %s26_s17 = ssub.s32 %s970_s21, %s1090_s15  ;;  %p36_p12 = scmp.ne.s32.totalorder %s966_s20, %s962_s19 }
  0x2c   : > { %p27_p13 = scmp.eq.s32.totalorder %s26_s17, 0  ;;  %p37_p0 = scmp.eq.s32.totalorder %s970_s21, 0 }
  0x2d   : > { %p1100_p5 = por %p150_p2, %p36_p12  ;;  %p761_p10 = scmp.lt.s32.totalorder %s970_s21, 2 }
  0x2e   : > { %s1106_s27 = scalar_select %p27_p13, %s966_s20, %s29_s16  }
  0x2f   : > { %s1237_s23 = scalar_select %p1100_p5, 1, 0 }
  0x30   : > { %p38_p3 = por %p37_p0, %p36_p12  ;;  %s208_s28 = sand.u32 1, %s966_s20  }
  0x31   : > { %s631_s29 = sshll.u32 %s208_s28, 3  ;;  %s665_s30 = sshll.u32 %s970_s21, 7 }
  0x32   : > { %s1113_s10 = scalar_lea.hbm %s1222_s0, %s665_s30  ;;  %s212_s11 = scalar_lea.vmem [#allocation2], %s631_s29 }
  0x33   : > { %s219_s12 = sshll.u32 %s212_s11, 4  ;;  %p1117_p2 = pnand %p761_p10, %p38_p3  ;;  %s1115_s12 = int_to_ptr.vmem [resolvable:$true] %s219_s12 }
  0x34   : > { %s1121_s14 = scalar_lea.sflag [#allocation3], %s208_s28  ;;  %s874_s16 = scalar_lea.hbm %s1113_s10, 128 }
  0x35   : > { %p875_p11 = scmp.ne.s32.totalorder %s1113_s10, %s874_s16  ;;  %p876_p7 = pneg %p1117_p2 }
  0x36   : > { %s879_s29 = scalar_lea.hbm %s1222_s0, 256  ;;  %p880_p13 = scmp.lt.s32.totalorder %s1113_s10, %s1222_s0 }
  0x37   : > { %p877_p9 = pnand %p876_p7, %p875_p11  ;;  %p881_p0 = scmp.lt.s32.totalorder %s879_s29, %s874_s16 }
  0x39   : > { %p878_p12 = pneg %p877_p9  ;;  %p882_p10 = por %p881_p0, %p880_p13 }
  0x3b   : > { %p883_p3 = pnand %p882_p10, %p878_p12 }
  0x3d   : > { %886 = shalt.err (!%p883_p3)
}
  0x3e   : > { %s887_s28 = scalar_lea.vmem %s1115_s12, 128  ;;  %s976_s11 = smov [#allocation2]  }
  0x3f   : > { %p888_p1 = scmp.ne.s32.totalorder %s1115_s12, %s887_s28  ;;  %s892_s8 = sshll.u32 %s976_s11, 4  ;;  %s893_s8 = int_to_ptr.vmem [resolvable:$false] %s892_s8 }
  0x40   : > { %s894_s17 = scalar_lea.vmem %s893_s8, 256  ;;  %p895_p9 = scmp.lt.s32.totalorder %s1115_s12, %s893_s8 }
  0x41   : > { %p890_p6 = pnand %p888_p1, %p876_p7  ;;  %p896_p5 = scmp.lt.s32.totalorder %s894_s17, %s887_s28 }
  0x43   : > { %p891_p11 = pneg %p890_p6  ;;  %p897_p4 = por %p896_p5, %p895_p9 }
  0x45   : > { %p898_p8 = pnand %p897_p4, %p891_p11 }
  0x47   : > { %901 = shalt.err (!%p898_p8)
}
  0x48   : > { %s1239_s16 = smov 64   ;;  %p1240_p1 = scmp.ne.s32.totalorder %s1235_s26, 0 }
  0x49   : > { %754 = dma.hbm_to_vmem [thread:$0]  (!%p1117_p2), %s1113_s10, 128, %s1115_s12, %s1121_s14, %s1239_s16, %s1239_s16, %s975_s9  }
  0x4a   : > { %231 = sbr.rel (%p1240_p1) target bundleno = 535 (0x217), region = 40  ;;  %s1148_s30 = sand.u32 (!%p1240_p1), 1, %s962_s19  }
  0x4b   : > { %s635_s8 = sshll.u32 (!%p1240_p1), %s1148_s30, 3  ;;  %s234_s29 = scalar_lea.sflag (!%p1240_p1), [#allocation3], %s1148_s30 }
  0x4c   : > { %s1154_s13 = scalar_lea.vmem (!%p1240_p1), [#allocation2], %s635_s8  ;;  %p1241_p4 = scmp.ne.s32.totalorder (!%p1240_p1), %s1233_s24, 0 }
  0x4f   : > { %945 = dma.done.wait (%p1241_p4), %s234_s29, 128  }
  0x50   : > { %947 = vsyncadd (%p1241_p4), %s234_s29, 4294967168  ;;  %p1242_p6 = scmp.eq.s32.totalorder %s1033_s22, 0 }
  0x52   : > { %949 = dma.done.wait (%p1242_p6), [#allocation6], 2048   ;;  %p1243_p8 = pmov %p1242_p6 }
  0x53   : > { %v977_v0 = vmov 0.0   ;;  %vm978_vm0 = vmmov 0   ;;  %v805_v1 = vld [vmem:[#allocation5 + $0x38] sm:$0xff]   ;;  %v806_v2 = vld [vmem:[#allocation5 + $0x30] sm:$0xff]   ;;  %v807_v3 = vld [vmem:[#allocation5 + $0x28] sm:$0xff]   ;;  %s271_s12 = scalar_lea.vmem [#allocation8], %s635_s8 }
  0x54   : > { %951 = vsyncadd (%p1243_p8), [#allocation6], 4294965248  ;;  %692 = vmatprep.subr.bf16.mxu0 %v977_v0  ;;  %708 = vmatprep.mubr.msk.bf16.mxu0 %vm978_vm0, %v977_v0  ;;  %v814_v4 = vld [vmem:[#allocation7 + $0x38] sm:$0xff]   ;;  %v808_v5 = vld [vmem:[#allocation5 + $0x20] sm:$0xff]   ;;  %s534_s14 = sshll.u32 %s271_s12, 4  ;;  %s668_s6 = sshll.u32 %s1033_s22, 7  ;;  %s1174_s14 = int_to_ptr.vmem [resolvable:$true] %s534_s14 }
  0x55   : > { %712 = vmatprep.subr.bf16.mxu1 %v977_v0  ;;  %728 = vmatprep.mubr.msk.bf16.mxu1 %vm978_vm0, %v977_v0  ;;  %v815_v6 = vld [vmem:[#allocation7 + $0x30] sm:$0xff]   ;;  %v809_v7 = vld [vmem:[#allocation5 + $0x18] sm:$0xff]   ;;  %v816_v8 = vld [vmem:[#allocation7 + $0x28] sm:$0xff]   ;;  %s1179_s11 = scalar_lea.hbm %s1227_s5, %s668_s6  ;;  %s521_s17 = scalar_lea.sflag [#allocation4], %s1148_s30 }
  0x56   : > { %693 = vmatpush3.bf16.msra.mxu0 %v805_v1  ;;  %713 = vmatpush3.bf16.msra.mxu1 %v814_v4  ;;  %v810_v9 = vld [vmem:[#allocation5 + $0x10] sm:$0xff]   ;;  %v817_v10 = vld [vmem:[#allocation7 + $0x20] sm:$0xff]   ;;  %v811_v11 = vld [vmem:[#allocation5 + $0x8] sm:$0xff]   ;;  %s902_s16 = scalar_lea.vmem %s1174_s14, 128  ;;  %p1244_p2 = scmp.ne.s32.totalorder %s1237_s23, 0 }
  0x57   : > { %694 = vmatprep.subr.bf16.mxu0 %v977_v0  ;;  %714 = vmatprep.subr.bf16.mxu1 %v977_v0  ;;  %v818_v12 = vld [vmem:[#allocation7 + $0x18] sm:$0xff]   ;;  %v812_v13 = vld [vmem:[#allocation5] sm:$0xff]   ;;  %v819_v15 = vld [vmem:[#allocation7 + $0x10] sm:$0xff]   ;;  %p903_p5 = scmp.ne.s32.totalorder %s1174_s14, %s902_s16  ;;  %s979_s22 = smov [#allocation8]  }
  0x58   : > { %v813_v14 = vld [vmem:[%s1154_s13] sm:$0xff]   ;;  %v820_v16 = vld [vmem:[#allocation7 + $0x8] sm:$0xff]   ;;  %v821_v17 = vld [vmem:[#allocation7] sm:$0xff]   ;;  %s906_s8 = sshll.u32 %s979_s22, 4  ;;  %s907_s8 = int_to_ptr.vmem [resolvable:$false] %s906_s8 }
  0x59   : > { %v639_v18 = vld [vmem:[%s1224_s2] ss:$0 sm:$0xff]  ;;  %p904_p7 = pnand %p903_p5, %p1244_p2  ;;  %s908_s29 = scalar_lea.vmem %s907_s8, 256 }
  0x5a   : > { %695 = vmatpush3.bf16.msra.mxu0 %v806_v2  ;;  %715 = vmatpush3.bf16.msra.mxu1 %v815_v6  ;;  %v649_v29 = vld [vmem:[%s1226_s4] ss:$0 sm:$0xff]  ;;  %p909_p13 = scmp.lt.s32.totalorder %s1174_s14, %s907_s8  ;;  %p910_p0 = scmp.lt.s32.totalorder %s908_s29, %s902_s16 }
  0x5b   : > { %696 = vmatprep.subr.bf16.mxu0 %v977_v0  ;;  %716 = vmatprep.subr.bf16.mxu1 %v977_v0  ;;  %p905_p12 = pneg %p904_p7 }
  0x5c   : > { %p911_p10 = por %p910_p0, %p909_p13 }
  0x5e   : > { %697 = vmatpush3.bf16.msra.mxu0 %v807_v3  ;;  %717 = vmatpush3.bf16.msra.mxu1 %v816_v8  ;;  %p912_p3 = pnand %p911_p10, %p905_p12 }
  0x5f   : > { %698 = vmatprep.subr.bf16.mxu0 %v977_v0  ;;  %718 = vmatprep.subr.bf16.mxu1 %v977_v0 }
  0x62   : > { %699 = vmatpush3.bf16.msra.mxu0 %v808_v5  ;;  %719 = vmatpush3.bf16.msra.mxu1 %v817_v10 }
  0x63   : > { %700 = vmatprep.subr.bf16.mxu0 %v977_v0  ;;  %720 = vmatprep.subr.bf16.mxu1 %v977_v0 }
  0x66   : > { %701 = vmatpush3.bf16.msra.mxu0 %v809_v7  ;;  %721 = vmatpush3.bf16.msra.mxu1 %v818_v12 }
  0x67   : > { %702 = vmatprep.subr.bf16.mxu0 %v977_v0  ;;  %722 = vmatprep.subr.bf16.mxu1 %v977_v0 }
  0x6a   : > { %703 = vmatpush3.bf16.msra.mxu0 %v810_v9  ;;  %723 = vmatpush3.bf16.msra.mxu1 %v819_v15 }
  0x6b   : > { %704 = vmatprep.subr.bf16.mxu0 %v977_v0  ;;  %724 = vmatprep.subr.bf16.mxu1 %v977_v0 }
  0x6e   : > { %705 = vmatpush3.bf16.msra.mxu0 %v811_v11  ;;  %725 = vmatpush3.bf16.msra.mxu1 %v820_v16 }
  0x6f   : > { %706 = vmatprep.subr.bf16.mxu0 %v977_v0  ;;  %726 = vmatprep.subr.bf16.mxu1 %v977_v0 }
  0x72   : > { %707 = vmatpush3.bf16.msra.mxu0 %v812_v13  ;;  %727 = vmatpush3.bf16.msra.mxu1 %v821_v17 }
  0x75   : > { %709 = vmatmul.mubr.bf16.vlgmr.msra.gmra.mxu0 %v813_v14 }
 0x135   : > { %v388_v19 = vpop.f32.mrf.mxu0 }
 0x136   : > { %v389_v21 = vadd.f32 %v639_v18, %v388_v19 }
 0x137   : > { %v710_v20 = vpop.f32.mrf.mxu0 }
 0x138   : > { %v395_v25 = vmax.f32 %v389_v21, 0.0 }
 0x139   : > { %v391_v22 = vpop.f32.mrf.mxu0 }
 0x13a   : > { %v392_v23 = vadd.f32 %v639_v18, %v391_v22 }
 0x13b   : > { %v711_v24 = vpop.f32.mrf.mxu0 }
 0x13c   : > { %v396_v26 = vmax.f32 %v392_v23, 0.0 }
 0x13e   : > { %v397_v27 = vpack.c.bf16 %v396_v26, %v395_v25 }
 0x140   : > { %729 = vmatmul.mubr.bf16.vlgmr.msra.gmra.mxu1 %v397_v27 }
 0x200   : > { %v503_v28 = vpop.f32.mrf.mxu1 }
 0x201   : > { %v504_v32 = vadd.f32 %v649_v29, %v503_v28 }
 0x202   : > { %v730_v30 = vpop.f32.mrf.mxu1 }
 0x204   : > { %v506_v31 = vpop.f32.mrf.mxu1 }
 0x205   : > { %v507_v33 = vadd.f32 %v649_v29, %v506_v31 }
 0x206   : > { %v731_v34 = vpop.f32.mrf.mxu1 }
 0x207   : > { %v672_v35 = vpack.c.bf16 %v507_v33, %v504_v32 }
 0x209   : > { %673 = vst [vmem:[%s271_s12] sm:$0xff] %v672_v35  }
 0x20a   : > { %915 = shalt.err (!%p912_p3)
}
 0x20b   : > { %s916_s13 = scalar_lea.hbm %s1179_s11, 128  ;;  %s920_s9 = scalar_lea.hbm %s1227_s5, 256 }
 0x20c   : > { %p917_p11 = scmp.ne.s32.totalorder %s1179_s11, %s916_s13  ;;  %p921_p4 = scmp.lt.s32.totalorder %s1179_s11, %s1227_s5 }
 0x20d   : > { %p922_p6 = scmp.lt.s32.totalorder %s920_s9, %s916_s13 }
 0x20e   : > { %p918_p9 = pnand %p917_p11, %p1244_p2 }
 0x20f   : > { %p923_p8 = por %p922_p6, %p921_p4 }
 0x210   : > { %p919_p1 = pneg %p918_p9 }
 0x212   : > { %p924_p5 = pnand %p923_p8, %p919_p1 }
 0x214   : > { %927 = shalt.err (!%p924_p5)
}
 0x215   : > { %s980_s6 = smov 64   ;;  %s981_s7 = smov 4  }
 0x216   : > { %742 = dma.vmem_to_hbm [thread:$0]  (%p1244_p2), %s1174_s14, 128, %s1179_s11, %s521_s17, %s980_s6, %s980_s6, %s981_s7  }
 0x217 PF: > { %s549_s28 = sand.u32 1, %s958_s18   ;;  %p1245_p7 = scmp.ne.s32.totalorder %s1234_s25, 0 }
 0x218   : > { %p1246_p12 = scmp.ge.s32.totalorder %s970_s21, 2  ;;  %s550_s16 = scalar_lea.sflag [#allocation4], %s549_s28 }
 0x21a   : > { %p756_p13 = pnand %p1246_p12, %p1245_p7 }
 0x21c   : > { %p757_p0 = pneg %p756_p13 }
 0x21e   : > { %953 = dma.done.wait (%p757_p0), %s550_s16, 128  }
 0x21f   : > { %955 = vsyncadd (%p757_p0), %s550_s16, 4294967168  ;;  %p19_p10 = scmp.ge.s32.totalorder %s1090_s15, 4   ;;  %s1247_s18 = smov %s962_s19 }
 0x220   : > { %s1248_s19 = smov %s966_s20  ;;  %s1249_s20 = smov %s1106_s27 }
 0x221   : > { %s1250_s21 = smov %s1090_s15  ;;  %21 = sbr.rel (!%p19_p10) target bundleno = 6 (0x6), region = 93 }
 0x226   :  { %555 = vsyncpa [#allocation3], 1 }
 0x227   :  { %557 = vsyncpa [#allocation3 + $0x1], 1 }
 0x228   :  { %558 = vsyncpa [#allocation6], 1 }
 0x229   :  { %559 = vsyncpa [#allocation4], 1 }
 0x22a   :  { %561 = vsyncpa [#allocation4 + $0x1], 1 }

</bundles_post_ra>
